<compile_context>
chip_gen: v7x
topology: tpu7x:2x2x1
jax: 0.10.0
libtpu: 0.0.40
codegen_flags: <defaults>
</compile_context>

<pallas_src>
import jax
import jax.numpy as jnp
from jax.experimental import pallas as pl
from jax.experimental.pallas import tpu as pltpu


def _normalize_kernel(scale_ref, bias_ref, img_ref, out_ref):
    # scale_ref / bias_ref: (row_block, 1) f32 VMEM  (per-row channel constants)
    # img_ref   / out_ref : (row_block, col_block) f32 VMEM tile
    # Single VPU FMA per element -> pure HBM streaming.
    out_ref[...] = img_ref[...] * scale_ref[...] + bias_ref[...]


def _default_target_bytes():
    """Per-generation tile budget (bytes).  Conservative fallback: 4 MiB."""
    try:
        kind = jax.devices()[0].device_kind.lower()
    except Exception:
        return 4 << 20
    if "v5 lite" in kind or "v5e" in kind or "v5litepod" in kind:
        # 16 MiB default scoped VMEM; 4x tile = 12 MiB fits with headroom.
        return 3 << 20
    if "v7" in kind:
        # 3.2 TB/s HBM per TC: big tiles amortize step overhead; 4x tile = 32 MiB
        # stays well under the 64 MiB physical VMEM.
        return 8 << 20
    # v6e and anything else.
    return 4 << 20


def _pick_tiles(R, L, elem_bytes, target_bytes):
    """Choose (row_block, col_block) for a lane-dense ~target_bytes tile.

    Constraints honored:
      * col_block is a multiple of 128 (or the full dim when L < 128).
      * row_block is a multiple of 8 (or the full dim).
      * If L is a multiple of 128, prefer a 128-multiple divisor of L so the
        last column block is never ragged (no wasted partial pipeline step).
      * Guarantee >1 grid block for mid-size inputs (megacore on v7x).
    """
    # ---- column (lane) block ------------------------------------------------
    if L < 128:
        col_block = L                                  # full dim is always legal
    else:
        # Cap so an 8-row slab of one column block stays inside the budget.
        cap = max(128, min(L, target_bytes // (8 * elem_bytes)))
        cap = (cap // 128) * 128
        if L % 128 == 0:
            # Largest 128-multiple divisor of L that is <= cap.
            col_block = 128
            d = cap // 128
            while d >= 1:
                blk = d * 128
                if L % blk == 0:
                    col_block = blk
                    break
                d -= 1
        else:
            # Ragged last block (masked edge) is legal as long as the block
            # shape itself is a multiple of 128.
            col_block = min(cap, (L // 128) * 128)
            col_block = max(col_block, 128)

    # ---- row (sublane) block ------------------------------------------------
    bytes_per_row = col_block * elem_bytes
    rows_budget = max(1, target_bytes // bytes_per_row)
    if rows_budget >= R:
        row_block = R                                  # full dim is always legal
    else:
        row_block = max(8, (rows_budget // 8) * 8)     # multiple of 8 (f32)
        if row_block >= R:
            row_block = R

    # ---- ensure >=2 grid blocks for mid-size inputs (v7x megacore) ----------
    def _cdiv(a, b):
        return -(-a // b)

    total_bytes = R * L * elem_bytes
    if _cdiv(R, row_block) * _cdiv(L, col_block) == 1 and total_bytes > (2 << 20):
        if R >= 16:
            half = -(-R // 2)
            row_block = ((half + 7) // 8) * 8          # split rows into ~2 blocks
        elif col_block >= 256:
            col_block = max(128, ((col_block // 2) // 128) * 128)

    return row_block, col_block


def vgg_normalize(img, vgg_mean, vgg_std, target_bytes=None):
    """img: (N, C, H, W) float32; vgg_mean / vgg_std: (C,) float32."""
    N, C, H, W = img.shape
    assert vgg_mean.shape == (C,) and vgg_std.shape == (C,)

    R, L = N * C, H * W
    x = img.reshape(R, L)                              # lane-dense view (free)

    # Tiny (C,)-sized precompute in the wrapper: fused scale + bias (f32).
    inv_std = 1.0 / vgg_std
    scale = jnp.tile(inv_std, N).reshape(R, 1).astype(img.dtype)
    bias = jnp.tile(-vgg_mean * inv_std, N).reshape(R, 1).astype(img.dtype)

    elem_bytes = jnp.dtype(img.dtype).itemsize
    if target_bytes is None:
        target_bytes = _default_target_bytes()

    row_block, col_block = _pick_tiles(R, L, elem_bytes, target_bytes)
    grid = (pl.cdiv(R, row_block), pl.cdiv(L, col_block))

    # Explicit scoped-VMEM limit: in+out double-buffered = ~4x tile, plus the
    # tiny scale/bias buffers and headroom.  Never below the 32 MiB default.
    tile_bytes = row_block * col_block * elem_bytes
    vmem_limit = max(32 << 20, 4 * tile_bytes + (8 << 20))

    # Grid order: rows (i) outer, cols (j) inner -> scale/bias block (i, 0) is
    # reused across consecutive steps without re-DMA.
    img_spec = pl.BlockSpec((row_block, col_block), lambda i, j: (i, j))
    vec_spec = pl.BlockSpec((row_block, 1), lambda i, j: (i, 0))

    out = pl.pallas_call(
        _normalize_kernel,
        out_shape=jax.ShapeDtypeStruct((R, L), img.dtype),
        grid=grid,
        in_specs=[vec_spec, vec_spec, img_spec],
        out_specs=img_spec,
        compiler_params=pltpu.CompilerParams(
            dimension_semantics=("parallel", "parallel"),
            vmem_limit_bytes=int(vmem_limit),
        ),
    )(scale, bias, x)

    return out.reshape(N, C, H, W)


if __name__ == "__main__":
    # Deterministic parameters (from the module's __init__ — VGG ImageNet stats).
    vgg_mean = jnp.array([0.485, 0.456, 0.406], dtype=jnp.float32)
    vgg_std = jnp.array([0.229, 0.224, 0.225], dtype=jnp.float32)

    # Small example input: batch=2, channels=3 (RGB, fixed by the module), 16x16.
    key = jax.random.PRNGKey(0)
    img = jax.random.uniform(key, (2, 3, 16, 16), dtype=jnp.float32)

    out = vgg_normalize(img, vgg_mean, vgg_std)
    out = jax.block_until_ready(out)

    # Pure-JAX reference (divide form, exactly as in the PyTorch module).
    ref = (img - vgg_mean.reshape(1, 3, 1, 1)) / vgg_std.reshape(1, 3, 1, 1)
    assert out.shape == ref.shape and out.dtype == ref.dtype
    assert jnp.allclose(out, ref, atol=1e-5, rtol=1e-5)

    print("KERNEL_OK")
</pallas_src>

<mosaic_0001>
module attributes {stable_mosaic.version = 11 : i64} {
  func.func @_normalize_kernel(%arg0: i32, %arg1: i32, %arg2: memref<6x1xf32, #tpu.memory_space<vmem>>, %arg3: memref<6x1xf32, #tpu.memory_space<vmem>>, %arg4: memref<6x256xf32, #tpu.memory_space<vmem>>, %arg5: memref<6x256xf32, #tpu.memory_space<vmem>>) attributes {dimension_semantics = [#tpu.dimension_semantics<parallel>, #tpu.dimension_semantics<parallel>], iteration_bounds = array<i64: 1, 1>, scalar_prefetch = 0 : i64, scratch_operands = 0 : i64, tpu.core_type = #tpu.core_type<tc>, window_params = [{transform_indices = @transform_0, window_bounds = array<i64: 6, 1>}, {transform_indices = @transform_1, window_bounds = array<i64: 6, 1>}, {transform_indices = @transform_2, window_bounds = array<i64: 6, 256>}, {transform_indices = @transform_3, window_bounds = array<i64: 6, 256>}]} {
    %c0 = arith.constant 0 : index
    %c0_0 = arith.constant 0 : index
    %0 = vector.load %arg4[%c0, %c0_0] : memref<6x256xf32, #tpu.memory_space<vmem>>, vector<6x256xf32>
    %c0_1 = arith.constant 0 : index
    %c0_2 = arith.constant 0 : index
    %1 = vector.load %arg2[%c0_1, %c0_2] : memref<6x1xf32, #tpu.memory_space<vmem>>, vector<6x1xf32>
    %2 = vector.broadcast %1 : vector<6x1xf32> to vector<6x256xf32>
    %3 = arith.mulf %0, %2 : vector<6x256xf32>
    %c0_3 = arith.constant 0 : index
    %c0_4 = arith.constant 0 : index
    %4 = vector.load %arg3[%c0_3, %c0_4] : memref<6x1xf32, #tpu.memory_space<vmem>>, vector<6x1xf32>
    %5 = vector.broadcast %4 : vector<6x1xf32> to vector<6x256xf32>
    %6 = arith.addf %3, %5 : vector<6x256xf32>
    %c0_5 = arith.constant 0 : index
    %c0_6 = arith.constant 0 : index
    %7 = vector.load %arg5[%c0_5, %c0_6] : memref<6x256xf32, #tpu.memory_space<vmem>>, vector<6x256xf32>
    tpu.vector_store %arg5[%c0_5, %c0_6], %6 {strides = array<i32>} : memref<6x256xf32, #tpu.memory_space<vmem>>, vector<6x256xf32>,
    return
  }
  func.func @transform_0(%arg0: i32, %arg1: i32) -> (i32, i32) {
    %c0_i32 = arith.constant 0 : i32
    %c0_i32_0 = arith.constant 0 : i32
    return %arg0, %c0_i32 : i32, i32
  }
  func.func @transform_1(%arg0: i32, %arg1: i32) -> (i32, i32) {
    %c0_i32 = arith.constant 0 : i32
    %c0_i32_0 = arith.constant 0 : i32
    return %arg0, %c0_i32 : i32, i32
  }
  func.func @transform_2(%arg0: i32, %arg1: i32) -> (i32, i32) {
    %c0_i32 = arith.constant 0 : i32
    return %arg0, %arg1 : i32, i32
  }
  func.func @transform_3(%arg0: i32, %arg1: i32) -> (i32, i32) {
    %c0_i32 = arith.constant 0 : i32
    return %arg0, %arg1 : i32, i32
  }
}

</mosaic_0001>

<bundles_post_ra>
// kernel: tpu_custom_call.1
= control target key start
LH: loop header
LB: loop body
LE: loop exit
PB: predicated region body
PF: predicated region fallthrough
CT: control target
= control target key end

     0   :  { %v76_v1 = vmov 0   ;;  %s122_s0 = inlined_call_operand.vmem [shape: f32[6,1], index: 0, kind: input, shape index: {}]   ;;  %s123_s1 = inlined_call_operand.vmem [shape: f32[6,1], index: 1, kind: input, shape index: {}]   ;;  %s124_s2 = inlined_call_operand.vmem [shape: f32[6,256], index: 2, kind: input, shape index: {}]   ;;  %s125_s3 = inlined_call_operand.hbm [shape: f32[6,256], index: 3, kind: output, shape index: {}]  }
   0x1   :  { %v17_v0 = vld [vmem:[%s122_s0] sm:$0x3f]  ;;  %51 = vset.pattern.permute.xlu0 %v76_v1 }
   0x2   :  { %8 = vsyncpa [#allocation3], 0  ;;  %20 = vperm.xlu0 %51, %v17_v0   ;;  %v25_v2 = vld [vmem:[%s123_s1] sm:$0x3f]  ;;  %v16_v5 = vld [vmem:[%s124_s2 + $0x8] sm:$0x3f] }
   0x3   :  { %v15_v4 = vld [vmem:[%s124_s2] sm:$0x3f]  ;;  %s77_s20 = smov [#allocation2]  }
   0x4   :  { %s41_s0 = sshll.u32 %s77_s20, 4  ;;  %s42_s0 = int_to_ptr.vmem [resolvable:$true] %s41_s0 }
   0x5   :  { %s52_s1 = scalar_lea.vmem %s42_s0, 256  ;;  %p57_p1 = scmp.lt.s32.totalorder %s42_s0, %s42_s0 }
   0x6   :  { %28 = vperm.xlu0 %51, %v25_v2   ;;  %p53_p0 = scmp.ne.s32.totalorder %s42_s0, %s52_s1  ;;  %p58_p2 = scmp.lt.s32.totalorder %s52_s1, %s52_s1 }
   0x8   :  { %p59_p3 = por %p58_p2, %p57_p1 }
   0xa   :  { %p60_p4 = pnand %p59_p3, %p53_p0 }
  0x81   :  { %v21_v3 = vpop.permute.xlu0 %20 }
  0x82   :  { %v23_v6 = vmul.f32 %v21_v3, %v15_v4  ;;  %v24_v7 = vmul.f32 %v21_v3, %v16_v5 }
  0x85   :  { %v29_v8 = vpop.permute.xlu0 %28 }
  0x86   :  { %v31_v9 = vadd.f32 %v29_v8, %v23_v6  ;;  %v32_v10 = vadd.f32 %v29_v8, %v24_v7 }
  0x88   :  { %33 = vst [vmem:[#allocation2] sm:$0x3f] %v31_v9  ;;  %34 = vst [vmem:[#allocation2 + $0x8] sm:$0x3f] %v32_v10 }
  0x89   :  { %63 = shalt.err (!%p60_p4)
}
  0x8a   :  { %s64_s2 = scalar_lea.hbm %s125_s3, 256 }
  0x8b   :  { %p65_p5 = scmp.ne.s32.totalorder %s125_s3, %s64_s2  ;;  %p68_p6 = scmp.lt.u32.totalorder %s64_s2, %s125_s3 }
  0x8d   :  { %p70_p7 = pnand %p68_p6, %p65_p5 }
  0x8f   :  { %73 = shalt.err (!%p70_p7)
}
  0x90   :  { %44 = dma.vmem_to_hbm [thread:$0]  %s42_s0, 256, %s125_s3, [#allocation3]  }
  0x91   :  { %74 = dma.done.wait [#allocation3], 256  }
  0x92   :  { %75 = vsyncadd [#allocation3], 4294967040 }
  0x93   :  { %48 = vsyncpa [#allocation3], 1 }

</bundles_post_ra>
